<compile_context>
chip_gen: v7x
topology: tpu7x:2x2x1
jax: 0.10.0
libtpu: 0.0.40
codegen_flags: <defaults>
</compile_context>

<pallas_src>
import functools

import jax
import jax.numpy as jnp
from jax.experimental import pallas as pl
from jax.experimental.pallas import tpu as pltpu


# ------------------------------ helpers ------------------------------

def _round_up(x, m):
    return ((x + m - 1) // m) * m


def _vmem_capacity_bytes():
    # Generation-aware VMEM capacity (v5e/v6e: 128 MiB, v7x: 64 MiB per TensorCore).
    try:
        return int(pltpu.get_tpu_info().vmem_capacity_bytes)
    except Exception:
        return 64 << 20  # conservative fallback = v7x per-TC capacity


def _choose_tiles(T, V, itemsize, tile_t, tile_v, vmem_usable):
    tile_t = int(max(8, min(tile_t, _round_up(T, 8))))         # sublane granularity
    tile_v = int(max(128, min(tile_v, _round_up(V, 128))))     # lane granularity

    # v7x megacore: the "parallel" T axis is what shards across the 2 TensorCores;
    # make sure there are at least 2 T tiles whenever T allows it.
    if T > 8 and pl.cdiv(T, tile_t) < 2:
        tile_t = int(max(8, _round_up(pl.cdiv(T, 2), 8)))

    def _need(tt, tv):
        # double-buffered logits block + lane-padded labels/output/scratch + headroom
        return 2 * tt * tv * itemsize + 8 * tt * 128 * 4 + (4 << 20)

    # Shrink the reduction-axis tile first, then the T tile, until we fit the budget.
    while _need(tile_t, tile_v) > vmem_usable and tile_v > 128:
        tile_v = int(max(128, _round_up(tile_v // 2, 128)))
    while _need(tile_t, tile_v) > vmem_usable and tile_t > 8:
        tile_t = int(max(8, _round_up(tile_t // 2, 8)))
    return tile_t, tile_v


# ------------------------------ LM head: tiled cross-entropy ------------------------------

def _lm_ce_kernel(logits_ref, labels_ref, nll_ref, m_sc, l_sc, picked_sc, *, V, tile_v):
    v = pl.program_id(1)
    nv = pl.num_programs(1)

    @pl.when(v == 0)
    def _():
        m_sc[...] = jnp.full_like(m_sc, -jnp.inf)
        l_sc[...] = jnp.zeros_like(l_sc)
        picked_sc[...] = jnp.zeros_like(picked_sc)

    x = logits_ref[...].astype(jnp.float32)              # (tile_t, tile_v), cast after DMA
    labels_local = labels_ref[...] - v * tile_v          # (tile_t, 1) int32: local target column
    iota_row = jax.lax.broadcasted_iota(jnp.int32, (1, tile_v), 1)   # (1, tile_v)

    def _accumulate(xx):
        # Online log-sum-exp over the V axis + target-logit pick (no (T,V) one-hot).
        m_prev = m_sc[...]
        m_new = jnp.maximum(m_prev, jnp.max(xx, axis=-1, keepdims=True))
        alpha = jnp.exp(m_prev - m_new)                  # exp(-inf) == 0 on the first step
        l_sc[...] = l_sc[...] * alpha + jnp.sum(jnp.exp(xx - m_new), axis=-1, keepdims=True)
        m_sc[...] = m_new
        picked_sc[...] += jnp.sum(jnp.where(iota_row == labels_local, xx, 0.0),
                                  axis=-1, keepdims=True)

    if V % tile_v == 0:
        # Statically tile-divisible vocab: no masking anywhere.
        _accumulate(x)
    else:
        # Only the last V tile pays the tail-mask compare+select.
        @pl.when(v < nv - 1)
        def _():
            _accumulate(x)

        @pl.when(v == nv - 1)
        def _():
            rem = V - v * tile_v                         # valid columns in this (ragged) tile
            _accumulate(jnp.where(iota_row < rem, x, -1e30))

    @pl.when(v == nv - 1)
    def _():
        # Per-row negative log-likelihood (ignore_index filtering happens in the wrapper).
        nll_ref[...] = m_sc[...] + jnp.log(l_sc[...]) - picked_sc[...]


# ------------------------------ Blank head: pairwise BCE ------------------------------

def _blank_bce_kernel(f_ref, lab_ref, out_ref):
    f = f_ref[...].astype(jnp.float32)                   # (B, E)
    lab = lab_ref[...].astype(jnp.float32)               # (B, 1)
    B = f.shape[0]

    # Gram matrix of all pairwise dot products; contract dim 1 against dim 1 (no transpose).
    gram = jax.lax.dot_general(f, f, (((1,), (1,)), ((), ())),
                               preferred_element_type=jnp.float32)    # (B, B)

    # log sigmoid(g) = -softplus(-g), log(1 - sigmoid(g)) = -softplus(g); clamp at -100
    # to mirror PyTorch BCELoss clamping.
    def _softplus(z):
        return jnp.maximum(z, 0.0) + jnp.log(1.0 + jnp.exp(-jnp.abs(z)))

    log_p = jnp.maximum(-_softplus(-gram), -100.0)
    log_1mp = jnp.maximum(-_softplus(gram), -100.0)

    row = lab                                            # (B, 1) broadcast over cols
    col = lab.reshape(1, B)                              # (1, B) broadcast over rows
    ii = jax.lax.broadcasted_iota(jnp.int32, (B, B), 0)
    jj = jax.lax.broadcasted_iota(jnp.int32, (B, B), 1)

    # combinations(pos_idxs, 2): both positive, i < j (dot is symmetric).
    pos_mask = (row == 1.0) & (col == 1.0) & (ii < jj)
    # pos_idx x neg_idx: row positive, col negative (all ordered pairs).
    neg_mask = (row == 1.0) & (col == 0.0)

    pos_loss = jnp.sum(jnp.where(pos_mask, -log_p, 0.0))
    neg_loss = jnp.sum(jnp.where(neg_mask, -log_1mp, 0.0))

    # Analytic pair count (labels assumed strictly {0,1}, as in the PyTorch module).
    n_pos = jnp.sum(lab)
    n_neg = float(B) - n_pos
    n_pairs = 0.5 * n_pos * (n_pos - 1.0) + n_pos * n_neg
    # Guarded denominator (original PyTorch would NaN/fail on an empty pair set).
    out_ref[0, 0] = (pos_loss + neg_loss) / jnp.maximum(n_pairs, 1.0)


def _blank_bce_jax(f, lab2d):
    # Pure-JAX fallback for large B (untiled (B,B) gram would not fit VMEM comfortably).
    f = f.astype(jnp.float32)
    lab = lab2d.astype(jnp.float32)
    B = f.shape[0]
    gram = f @ f.T
    sp = lambda z: jnp.maximum(z, 0.0) + jnp.log1p(jnp.exp(-jnp.abs(z)))
    log_p = jnp.maximum(-sp(-gram), -100.0)
    log_1mp = jnp.maximum(-sp(gram), -100.0)
    row = lab
    col = lab.reshape(1, B)
    ii = jnp.arange(B)[:, None]
    jj = jnp.arange(B)[None, :]
    pos_mask = (row == 1.0) & (col == 1.0) & (ii < jj)
    neg_mask = (row == 1.0) & (col == 0.0)
    pos_loss = jnp.sum(jnp.where(pos_mask, -log_p, 0.0))
    neg_loss = jnp.sum(jnp.where(neg_mask, -log_1mp, 0.0))
    n_pos = jnp.sum(lab)
    n_neg = float(B) - n_pos
    n_pairs = 0.5 * n_pos * (n_pos - 1.0) + n_pos * n_neg
    return (pos_loss + neg_loss) / jnp.maximum(n_pairs, 1.0)


# ------------------------------ Wrapper ------------------------------

def two_headed_loss(lm_logits, lm_labels, blank_logits, blank_labels, *,
                    lm_ignore_idx, tile_t=512, tile_v=4096):
    # Flatten (batch, seq, vocab) -> (T, V); do NOT upcast or pad at the HBM boundary.
    lm_logits = lm_logits.reshape(-1, lm_logits.shape[-1])
    lm_labels_flat = lm_labels.reshape(-1).astype(jnp.int32)
    T, V = lm_logits.shape
    itemsize = jnp.dtype(lm_logits.dtype).itemsize

    capacity = _vmem_capacity_bytes()
    vmem_usable = max(32 << 20, capacity - (16 << 20))   # leave headroom for the compiler

    tile_t, tile_v = _choose_tiles(T, V, itemsize, tile_t, tile_v, vmem_usable)
    grid = (pl.cdiv(T, tile_t), pl.cdiv(V, tile_v))       # ragged tails masked/dropped in-kernel

    vmem_limit = int(min(max(2 * tile_t * tile_v * itemsize
                             + 8 * tile_t * 128 * 4 + (4 << 20),
                             8 << 20),
                         vmem_usable))

    cost = pl.CostEstimate(
        flops=int(6 * T * V),
        transcendentals=int(T * V),
        bytes_accessed=int(T * V * itemsize + T * 4 + T * 4),  # logits + labels + nll out
    )

    lm_kernel = functools.partial(_lm_ce_kernel, V=V, tile_v=tile_v)

    # TODO(synk): if DMA is still exposed on v7x, sweep pipeline_mode=pl.Buffered(3) on the logits spec.
    nll = pl.pallas_call(
        lm_kernel,
        out_shape=jax.ShapeDtypeStruct((T, 1), jnp.float32),
        grid_spec=pltpu.PrefetchScalarGridSpec(
            num_scalar_prefetch=0,
            grid=grid,
            in_specs=[
                pl.BlockSpec((tile_t, tile_v), lambda t, v: (t, v)),
                pl.BlockSpec((tile_t, 1), lambda t, v: (t, 0)),
            ],
            out_specs=pl.BlockSpec((tile_t, 1), lambda t, v: (t, 0)),
            scratch_shapes=[pltpu.VMEM((tile_t, 1), jnp.float32)] * 3,
        ),
        compiler_params=pltpu.CompilerParams(
            dimension_semantics=("parallel", "arbitrary"),
            vmem_limit_bytes=vmem_limit,
        ),
        cost_estimate=cost,
    )(lm_logits, lm_labels_flat.reshape(-1, 1))

    # ignore_index handling + mean reduction in the wrapper (T-length, tiny).
    # Guarded denominator (original PyTorch NaNs when every token is ignored).
    valid = lm_labels_flat != lm_ignore_idx
    lm_loss = (jnp.sum(jnp.where(valid, nll[:, 0], 0.0))
               / jnp.maximum(jnp.sum(valid.astype(jnp.float32)), 1.0))

    # ---- blank head ----
    B, E = blank_logits.shape
    lab2d = blank_labels.reshape(-1, 1).astype(jnp.float32)
    blank_bytes = B * B * 4 + 2 * B * E * 4
    if blank_bytes > vmem_usable // 2:
        blank_loss = _blank_bce_jax(blank_logits, lab2d)
    else:
        blank_loss = pl.pallas_call(
            _blank_bce_kernel,
            out_shape=jax.ShapeDtypeStruct((1, 1), jnp.float32),
            in_specs=[
                pl.BlockSpec(memory_space=pltpu.MemorySpace.VMEM),
                pl.BlockSpec(memory_space=pltpu.MemorySpace.VMEM),
            ],
            out_specs=pl.BlockSpec(memory_space=pltpu.MemorySpace.SMEM),
        )(blank_logits, lab2d)[0, 0]

    return lm_loss + blank_loss


# ------------------------------ Pure-JAX reference (PyTorch semantics) ------------------------------

def _reference(lm_logits, lm_labels, blank_logits, blank_labels, lm_ignore_idx):
    logits = lm_logits.astype(jnp.float32)
    logp = jax.nn.log_softmax(logits, axis=-1)
    picked = jnp.take_along_axis(logp, lm_labels[:, None], axis=-1)[:, 0]
    valid = (lm_labels != lm_ignore_idx).astype(jnp.float32)
    lm_loss = -jnp.sum(picked * valid) / jnp.sum(valid)

    f = blank_logits.astype(jnp.float32)
    gram = f @ f.T
    p = jax.nn.sigmoid(gram)
    lab = blank_labels.astype(jnp.float32)
    row = lab[:, None]
    col = lab[None, :]
    B = lab.shape[0]
    ii = jnp.arange(B)[:, None]
    jj = jnp.arange(B)[None, :]
    pos_mask = (row == 1.0) & (col == 1.0) & (ii < jj)
    neg_mask = (row == 1.0) & (col == 0.0)
    pos_loss = jnp.sum(jnp.where(pos_mask, -jnp.maximum(jnp.log(p), -100.0), 0.0))
    neg_loss = jnp.sum(jnp.where(neg_mask, -jnp.maximum(jnp.log(1.0 - p), -100.0), 0.0))
    n = jnp.sum(pos_mask) + jnp.sum(neg_mask)
    blank_loss = (pos_loss + neg_loss) / n
    return lm_loss + blank_loss


if __name__ == "__main__":
    LM_IGNORE_IDX = 0          # Two_Headed_Loss(lm_ignore_idx=0), use_logits=False, normalize=False

    T, V = 20, 300             # masked-token positions, vocab (exercises ragged T AND V tiles)
    B, E = 8, 32               # batch, relation-embedding size

    key = jax.random.PRNGKey(0)
    k1, k2, k3 = jax.random.split(key, 3)

    lm_logits = jax.random.normal(k1, (T, V), dtype=jnp.float32)
    lm_labels = jax.random.randint(k2, (T,), 1, V, dtype=jnp.int32)
    lm_labels = lm_labels.at[0].set(LM_IGNORE_IDX).at[3].set(LM_IGNORE_IDX)  # exercise ignore_index

    blank_logits = 0.5 * jax.random.normal(k3, (B, E), dtype=jnp.float32)
    blank_labels = jnp.array([1, 1, 1, 0, 0, 0, 1, 0], dtype=jnp.float32)    # 4 pos, 4 neg

    ref = _reference(lm_logits, lm_labels, blank_logits, blank_labels, LM_IGNORE_IDX)

    # Small-tile path: 3 T-tiles (last ragged, 20 = 2*8 + 4) x 3 V-tiles (last ragged, 300 = 2*128 + 44).
    total = two_headed_loss(lm_logits, lm_labels, blank_logits, blank_labels,
                            lm_ignore_idx=LM_IGNORE_IDX, tile_t=8, tile_v=128)
    total = jax.block_until_ready(total)
    assert jnp.allclose(total, ref, rtol=1e-3, atol=1e-3), (total, ref)

    # Default-tile path (auto-clamped; >=2 T tiles for megacore, single ragged V tile).
    total2 = two_headed_loss(lm_logits, lm_labels, blank_logits, blank_labels,
                             lm_ignore_idx=LM_IGNORE_IDX)
    total2 = jax.block_until_ready(total2)
    assert jnp.allclose(total2, ref, rtol=1e-3, atol=1e-3), (total2, ref)

    print("KERNEL_OK")
</pallas_src>

<mosaic_0001>
module attributes {stable_mosaic.version = 11 : i64} {
  func.func @_lm_ce_kernel(%arg0: i32, %arg1: i32, %arg2: memref<8x128xf32, #tpu.memory_space<vmem>>, %arg3: memref<8x1xi32, #tpu.memory_space<vmem>>, %arg4: memref<8x1xf32, #tpu.memory_space<vmem>>, %arg5: memref<8x1xf32, #tpu.memory_space<vmem>>, %arg6: memref<8x1xf32, #tpu.memory_space<vmem>>, %arg7: memref<8x1xf32, #tpu.memory_space<vmem>>) attributes {dimension_semantics = [#tpu.dimension_semantics<parallel>, #tpu.dimension_semantics<arbitrary>], iteration_bounds = array<i64: 3, 3>, scalar_prefetch = 0 : i64, scratch_operands = 3 : i64, tpu.core_type = #tpu.core_type<tc>, window_params = [{transform_indices = @transform_0, window_bounds = array<i64: 8, 128>}, {transform_indices = @transform_1, window_bounds = array<i64: 8, 1>}, {transform_indices = @transform_2, window_bounds = array<i64: 8, 1>}]} {
    %c0_i32 = arith.constant 0 : i32
    %0 = arith.cmpi eq, %arg1, %c0_i32 : i32
    %1 = arith.extui %0 : i1 to i32
    %c0_i32_0 = arith.constant 0 : i32
    %2 = arith.cmpi ne, %1, %c0_i32_0 : i32
    scf.if %2 {
      %cst = arith.constant 0xFF800000 : f32
      %18 = vector.broadcast %cst : f32 to vector<8x1xf32>
      %c0_9 = arith.constant 0 : index
      %c0_10 = arith.constant 0 : index
      %19 = vector.load %arg5[%c0_9, %c0_10] : memref<8x1xf32, #tpu.memory_space<vmem>>, vector<8x1xf32>
      tpu.vector_store %arg5[%c0_9, %c0_10], %18 {strides = array<i32>} : memref<8x1xf32, #tpu.memory_space<vmem>>, vector<8x1xf32>,
      %cst_11 = arith.constant 0.000000e+00 : f32
      %20 = vector.broadcast %cst_11 : f32 to vector<8x1xf32>
      %c0_12 = arith.constant 0 : index
      %c0_13 = arith.constant 0 : index
      %21 = vector.load %arg6[%c0_12, %c0_13] : memref<8x1xf32, #tpu.memory_space<vmem>>, vector<8x1xf32>
      tpu.vector_store %arg6[%c0_12, %c0_13], %20 {strides = array<i32>} : memref<8x1xf32, #tpu.memory_space<vmem>>, vector<8x1xf32>,
      %cst_14 = arith.constant 0.000000e+00 : f32
      %22 = vector.broadcast %cst_14 : f32 to vector<8x1xf32>
      %c0_15 = arith.constant 0 : index
      %c0_16 = arith.constant 0 : index
      %23 = vector.load %arg7[%c0_15, %c0_16] : memref<8x1xf32, #tpu.memory_space<vmem>>, vector<8x1xf32>
      tpu.vector_store %arg7[%c0_15, %c0_16], %22 {strides = array<i32>} : memref<8x1xf32, #tpu.memory_space<vmem>>, vector<8x1xf32>,
    } else {
    }
    %c0 = arith.constant 0 : index
    %c0_1 = arith.constant 0 : index
    %3 = vector.load %arg2[%c0, %c0_1] : memref<8x128xf32, #tpu.memory_space<vmem>>, vector<8x128xf32>
    %c0_2 = arith.constant 0 : index
    %c0_3 = arith.constant 0 : index
    %4 = vector.load %arg3[%c0_2, %c0_3] : memref<8x1xi32, #tpu.memory_space<vmem>>, vector<8x1xi32>
    %c128_i32 = arith.constant 128 : i32
    %5 = arith.muli %arg1, %c128_i32 : i32
    %6 = vector.broadcast %5 : i32 to vector<8x1xi32>
    %7 = arith.subi %4, %6 : vector<8x1xi32>
    %8 = tpu.iota {dimensions = array<i32: 1>} : vector<1x128xi32>
    %c2_i32 = arith.constant 2 : i32
    %9 = arith.cmpi slt, %arg1, %c2_i32 : i32
    %10 = arith.extui %9 : i1 to i32
    %c0_i32_4 = arith.constant 0 : i32
    %11 = arith.cmpi ne, %10, %c0_i32_4 : i32
    scf.if %11 {
      %c0_9 = arith.constant 0 : index
      %c0_10 = arith.constant 0 : index
      %18 = vector.load %arg5[%c0_9, %c0_10] : memref<8x1xf32, #tpu.memory_space<vmem>>, vector<8x1xf32>
      %cst = arith.constant dense<0xFF800000> : vector<8xf32>
      %19 = vector.multi_reduction <maximumf>, %3, %cst [1] : vector<8x128xf32> to vector<8xf32>
      %20 = vector.shape_cast %19 : vector<8xf32> to vector<8x1xf32>
      %21 = arith.maximumf %18, %20 : vector<8x1xf32>
      %22 = arith.subf %18, %21 : vector<8x1xf32>
      %23 = math.exp %22 : vector<8x1xf32>
      %c0_11 = arith.constant 0 : index
      %c0_12 = arith.constant 0 : index
      %24 = vector.load %arg6[%c0_11, %c0_12] : memref<8x1xf32, #tpu.memory_space<vmem>>, vector<8x1xf32>
      %25 = arith.mulf %24, %23 : vector<8x1xf32>
      %26 = vector.broadcast %21 : vector<8x1xf32> to vector<8x128xf32>
      %27 = arith.subf %3, %26 : vector<8x128xf32>
      %28 = math.exp %27 : vector<8x128xf32>
      %cst_13 = arith.constant dense<0.000000e+00> : vector<8xf32>
      %29 = vector.multi_reduction <add>, %28, %cst_13 [1] : vector<8x128xf32> to vector<8xf32>
      %30 = vector.shape_cast %29 : vector<8xf32> to vector<8x1xf32>
      %31 = arith.addf %25, %30 : vector<8x1xf32>
      %c0_14 = arith.constant 0 : index
      %c0_15 = arith.constant 0 : index
      %32 = vector.load %arg6[%c0_14, %c0_15] : memref<8x1xf32, #tpu.memory_space<vmem>>, vector<8x1xf32>
      tpu.vector_store %arg6[%c0_14, %c0_15], %31 {strides = array<i32>} : memref<8x1xf32, #tpu.memory_space<vmem>>, vector<8x1xf32>,
      %c0_16 = arith.constant 0 : index
      %c0_17 = arith.constant 0 : index
      %33 = vector.load %arg5[%c0_16, %c0_17] : memref<8x1xf32, #tpu.memory_space<vmem>>, vector<8x1xf32>
      tpu.vector_store %arg5[%c0_16, %c0_17], %21 {strides = array<i32>} : memref<8x1xf32, #tpu.memory_space<vmem>>, vector<8x1xf32>,
      %c0_18 = arith.constant 0 : index
      %c0_19 = arith.constant 0 : index
      %34 = vector.load %arg7[%c0_18, %c0_19] : memref<8x1xf32, #tpu.memory_space<vmem>>, vector<8x1xf32>
      %35 = vector.broadcast %8 : vector<1x128xi32> to vector<8x128xi32>
      %36 = vector.broadcast %7 : vector<8x1xi32> to vector<8x128xi32>
      %37 = arith.cmpi eq, %35, %36 : vector<8x128xi32>
      %cst_20 = arith.constant 0.000000e+00 : f32
      %38 = vector.broadcast %cst_20 : f32 to vector<8x128xf32>
      %39 = arith.select %37, %3, %38 : vector<8x128xi1>, vector<8x128xf32>
      %cst_21 = arith.constant dense<0.000000e+00> : vector<8xf32>
      %40 = vector.multi_reduction <add>, %39, %cst_21 [1] : vector<8x128xf32> to vector<8xf32>
      %41 = vector.shape_cast %40 : vector<8xf32> to vector<8x1xf32>
      %42 = arith.addf %34, %41 : vector<8x1xf32>
      %c0_22 = arith.constant 0 : index
      %c0_23 = arith.constant 0 : index
      %43 = vector.load %arg7[%c0_22, %c0_23] : memref<8x1xf32, #tpu.memory_space<vmem>>, vector<8x1xf32>
      tpu.vector_store %arg7[%c0_22, %c0_23], %42 {strides = array<i32>} : memref<8x1xf32, #tpu.memory_space<vmem>>, vector<8x1xf32>,
    } else {
    }
    %c2_i32_5 = arith.constant 2 : i32
    %12 = arith.cmpi eq, %arg1, %c2_i32_5 : i32
    %13 = arith.extui %12 : i1 to i32
    %c0_i32_6 = arith.constant 0 : i32
    %14 = arith.cmpi ne, %13, %c0_i32_6 : i32
    scf.if %14 {
      %c128_i32_9 = arith.constant 128 : i32
      %18 = arith.muli %arg1, %c128_i32_9 : i32
      %c300_i32 = arith.constant 300 : i32
      %19 = arith.subi %c300_i32, %18 : i32
      %20 = vector.broadcast %19 : i32 to vector<1x128xi32>
      %21 = arith.cmpi slt, %8, %20 : vector<1x128xi32>
      %cst = arith.constant -1.000000e+30 : f32
      %22 = vector.shape_cast %21 : vector<1x128xi1> to vector<1x128xi1>
      %23 = vector.broadcast %22 : vector<1x128xi1> to vector<8x128xi1>
      %24 = vector.broadcast %cst : f32 to vector<8x128xf32>
      %25 = arith.select %23, %3, %24 : vector<8x128xi1>, vector<8x128xf32>
      %c0_10 = arith.constant 0 : index
      %c0_11 = arith.constant 0 : index
      %26 = vector.load %arg5[%c0_10, %c0_11] : memref<8x1xf32, #tpu.memory_space<vmem>>, vector<8x1xf32>
      %cst_12 = arith.constant dense<0xFF800000> : vector<8xf32>
      %27 = vector.multi_reduction <maximumf>, %25, %cst_12 [1] : vector<8x128xf32> to vector<8xf32>
      %28 = vector.shape_cast %27 : vector<8xf32> to vector<8x1xf32>
      %29 = arith.maximumf %26, %28 : vector<8x1xf32>
      %30 = arith.subf %26, %29 : vector<8x1xf32>
      %31 = math.exp %30 : vector<8x1xf32>
      %c0_13 = arith.constant 0 : index
      %c0_14 = arith.constant 0 : index
      %32 = vector.load %arg6[%c0_13, %c0_14] : memref<8x1xf32, #tpu.memory_space<vmem>>, vector<8x1xf32>
      %33 = arith.mulf %32, %31 : vector<8x1xf32>
      %34 = vector.broadcast %29 : vector<8x1xf32> to vector<8x128xf32>
      %35 = arith.subf %25, %34 : vector<8x128xf32>
      %36 = math.exp %35 : vector<8x128xf32>
      %cst_15 = arith.constant dense<0.000000e+00> : vector<8xf32>
      %37 = vector.multi_reduction <add>, %36, %cst_15 [1] : vector<8x128xf32> to vector<8xf32>
      %38 = vector.shape_cast %37 : vector<8xf32> to vector<8x1xf32>
      %39 = arith.addf %33, %38 : vector<8x1xf32>
      %c0_16 = arith.constant 0 : index
      %c0_17 = arith.constant 0 : index
      %40 = vector.load %arg6[%c0_16, %c0_17] : memref<8x1xf32, #tpu.memory_space<vmem>>, vector<8x1xf32>
      tpu.vector_store %arg6[%c0_16, %c0_17], %39 {strides = array<i32>} : memref<8x1xf32, #tpu.memory_space<vmem>>, vector<8x1xf32>,
      %c0_18 = arith.constant 0 : index
      %c0_19 = arith.constant 0 : index
      %41 = vector.load %arg5[%c0_18, %c0_19] : memref<8x1xf32, #tpu.memory_space<vmem>>, vector<8x1xf32>
      tpu.vector_store %arg5[%c0_18, %c0_19], %29 {strides = array<i32>} : memref<8x1xf32, #tpu.memory_space<vmem>>, vector<8x1xf32>,
      %c0_20 = arith.constant 0 : index
      %c0_21 = arith.constant 0 : index
      %42 = vector.load %arg7[%c0_20, %c0_21] : memref<8x1xf32, #tpu.memory_space<vmem>>, vector<8x1xf32>
      %43 = vector.broadcast %8 : vector<1x128xi32> to vector<8x128xi32>
      %44 = vector.broadcast %7 : vector<8x1xi32> to vector<8x128xi32>
      %45 = arith.cmpi eq, %43, %44 : vector<8x128xi32>
      %cst_22 = arith.constant 0.000000e+00 : f32
      %46 = vector.broadcast %cst_22 : f32 to vector<8x128xf32>
      %47 = arith.select %45, %25, %46 : vector<8x128xi1>, vector<8x128xf32>
      %cst_23 = arith.constant dense<0.000000e+00> : vector<8xf32>
      %48 = vector.multi_reduction <add>, %47, %cst_23 [1] : vector<8x128xf32> to vector<8xf32>
      %49 = vector.shape_cast %48 : vector<8xf32> to vector<8x1xf32>
      %50 = arith.addf %42, %49 : vector<8x1xf32>
      %c0_24 = arith.constant 0 : index
      %c0_25 = arith.constant 0 : index
      %51 = vector.load %arg7[%c0_24, %c0_25] : memref<8x1xf32, #tpu.memory_space<vmem>>, vector<8x1xf32>
      tpu.vector_store %arg7[%c0_24, %c0_25], %50 {strides = array<i32>} : memref<8x1xf32, #tpu.memory_space<vmem>>, vector<8x1xf32>,
    } else {
    }
    %c2_i32_7 = arith.constant 2 : i32
    %15 = arith.cmpi eq, %arg1, %c2_i32_7 : i32
    %16 = arith.extui %15 : i1 to i32
    %c0_i32_8 = arith.constant 0 : i32
    %17 = arith.cmpi ne, %16, %c0_i32_8 : i32
    scf.if %17 {
      %c0_9 = arith.constant 0 : index
      %c0_10 = arith.constant 0 : index
      %18 = vector.load %arg5[%c0_9, %c0_10] : memref<8x1xf32, #tpu.memory_space<vmem>>, vector<8x1xf32>
      %c0_11 = arith.constant 0 : index
      %c0_12 = arith.constant 0 : index
      %19 = vector.load %arg6[%c0_11, %c0_12] : memref<8x1xf32, #tpu.memory_space<vmem>>, vector<8x1xf32>
      %20 = math.log %19 : vector<8x1xf32>
      %21 = arith.addf %18, %20 : vector<8x1xf32>
      %c0_13 = arith.constant 0 : index
      %c0_14 = arith.constant 0 : index
      %22 = vector.load %arg7[%c0_13, %c0_14] : memref<8x1xf32, #tpu.memory_space<vmem>>, vector<8x1xf32>
      %23 = arith.subf %21, %22 : vector<8x1xf32>
      %c0_15 = arith.constant 0 : index
      %c0_16 = arith.constant 0 : index
      %24 = vector.load %arg4[%c0_15, %c0_16] : memref<8x1xf32, #tpu.memory_space<vmem>>, vector<8x1xf32>
      tpu.vector_store %arg4[%c0_15, %c0_16], %23 {strides = array<i32>} : memref<8x1xf32, #tpu.memory_space<vmem>>, vector<8x1xf32>,
    } else {
    }
    return
  }
  func.func @transform_0(%arg0: i32, %arg1: i32) -> (i32, i32) {
    %c0_i32 = arith.constant 0 : i32
    return %arg0, %arg1 : i32, i32
  }
  func.func @transform_1(%arg0: i32, %arg1: i32) -> (i32, i32) {
    %c0_i32 = arith.constant 0 : i32
    %c0_i32_0 = arith.constant 0 : i32
    return %arg0, %c0_i32 : i32, i32
  }
  func.func @transform_2(%arg0: i32, %arg1: i32) -> (i32, i32) {
    %c0_i32 = arith.constant 0 : i32
    %c0_i32_0 = arith.constant 0 : i32
    return %arg0, %c0_i32 : i32, i32
  }
}

</mosaic_0001>

<bundles_post_ra>
// kernel: tpu_custom_call.1
= control target key start
LH: loop header
LB: loop body
LE: loop exit
PB: predicated region body
PF: predicated region fallthrough
CT: control target
= control target key end

     0   :  { %7 = vsyncpa [#allocation6], 0  ;;  %s785_s0 = inlined_call_operand.hbm [shape: f32[20,300], index: 0, kind: input, shape index: {}]   ;;  %s786_s1 = inlined_call_operand.vmem [shape: s32[20,1], index: 1, kind: input, shape index: {}]   ;;  %s787_s2 = inlined_call_operand.vmem [shape: f32[20,1], index: 2, kind: output, shape index: {}]  }
   0x1   :  { %9 = vsyncpa [#allocation6 + $0x1], 0  ;;  %s609_s9 = smov 0   ;;  %s611_s10 = smov 0  }
   0x2   :  { %s613_s11 = smov 0   ;;  %s615_s12 = smov 0  }
   0x3   :  { %s617_s13 = smov 0   ;;  %s619_s14 = smov 0  }
   0x4   :  { %s621_s15 = smov 0   ;;  %s623_s16 = smov 0  }
   0x5 LB: > { %s385_s17 = sadd.s32 4294967295, %s587_s16   ;;  %s24_s18 = sadd.s32 1, %s579_s14  ;;  %s587_s16 = sphi %s623_s16, %s15_s16   ;;  %s583_s15 = sphi %s621_s15, %s799_s15   ;;  %s579_s14 = sphi %s619_s14, %s798_s14   ;;  %s575_s13 = sphi %s617_s13, %s797_s13   ;;  %s571_s12 = sphi %s615_s12, %s796_s12   ;;  %s567_s11 = sphi %s613_s11, %s795_s11   ;;  %s563_s10 = sphi %s611_s10, %s794_s10   ;;  %s559_s9 = sphi %s609_s9, %s793_s9  }
   0x6   : > { %p25_p0 = scmp.ge.s32.totalorder %s24_s18, 3  ;;  %s27_s19 = sadd.s32 1, %s583_s15 }
   0x7   : > { %s36_s20 = sadd.s32 1, %s567_s11  ;;  %p43_p1 = scmp.ne.s32.totalorder %s567_s11, %s563_s10 }
   0x8   : > { %s801_s18 = smov (%p25_p0, %s24_s18), 0  ;;  %s803_s19 = smov (!%p25_p0, %s27_s19), %s583_s15 }
   0x9   : > { %s32_s21 = ssub.s32 %s579_s14, %s801_s18  ;;  %p44_p2 = scmp.eq.s32.totalorder %s587_s16, 0 }
   0xa   : > { %p29_p3 = scmp.ge.s32.totalorder %s803_s19, 3  ;;  %p49_p4 = scmp.ne.s32.totalorder %s563_s10, %s559_s9 }
   0xb   : > { %p660_p5 = por %p44_p2, %p43_p1  ;;  %p50_p6 = scmp.eq.s32.totalorder %s385_s17, 0 }
   0xc   : > { %s805_s19 = smov (%p29_p3, %s803_s19), 0  ;;  %p408_p8 = scmp.lt.s32.totalorder %s587_s16, 9 }
   0xd   : > { %p666_p7 = por %p50_p6, %p49_p4  ;;  %s31_s24 = ssub.s32 %s583_s15, %s805_s19 }
   0xe   : > { %s33_s25 = sor.u32 %s32_s21, %s31_s24  ;;  %s125_s26 = sand.u32 1, %s567_s11  }
   0xf   : > { %p34_p9 = scmp.eq.s32.totalorder %s33_s25, 0  ;;  %s389_s27 = sshll.u32 %s125_s26, 3 }
  0x10   : > { %s401_s28 = smul.u32 3, %s583_s15  ;;  %s129_s4 = scalar_lea.vmem [#allocation5], %s389_s27 }
  0x11   : > { %s676_s29 = scalar_select %p34_p9, %s567_s11, %s36_s20  }
  0x12   : > { %s134_s30 = sadd.s32 %s579_s14, %s401_s28  ;;  %s138_s5 = sshll.u32 %s129_s4, 4  ;;  %s684_s5 = int_to_ptr.vmem [resolvable:$true] %s138_s5 }
  0x13   : > { %s390_s3 = sshll.u32 %s134_s30, 7  ;;  %p690_p10 = pnand %p408_p8, %p660_p5 }
  0x14   : > { %s682_s8 = scalar_lea.hbm %s785_s0, %s390_s3  ;;  %s126_s17 = scalar_lea.sflag [#allocation6], %s125_s26 }
  0x15   : > { %s491_s20 = scalar_lea.hbm %s682_s8, 128  ;;  %p493_p0 = pneg %p690_p10 }
  0x16   : > { %p492_p13 = scmp.ne.s32.totalorder %s682_s8, %s491_s20  ;;  %s496_s24 = scalar_lea.hbm %s785_s0, 1152 }
  0x17   : > { %p497_p3 = scmp.lt.u32.totalorder %s682_s8, %s785_s0  ;;  %p498_p4 = scmp.lt.u32.totalorder %s496_s24, %s491_s20 }
  0x18   : > { %p494_p1 = pnand %p493_p0, %p492_p13  ;;  %p500_p6 = scmp.lt.u32.totalorder %s491_s20, %s682_s8 }
  0x19   : > { %p499_p5 = por %p498_p4, %p497_p3 }
  0x1a   : > { %p495_p2 = pneg %p494_p1 }
  0x1b   : > { %p501_p8 = por %p500_p6, %p499_p5 }
  0x1d   : > { %p502_p9 = pnand %p501_p8, %p495_p2 }
  0x1f   : > { %505 = shalt.err (!%p502_p9)
}
  0x20   : > { %s506_s26 = scalar_lea.vmem %s684_s5, 128  ;;  %s589_s28 = smov [#allocation5]  }
  0x21   : > { %p507_p13 = scmp.ne.s32.totalorder %s684_s5, %s506_s26  ;;  %s511_s30 = sshll.u32 %s589_s28, 4  ;;  %s512_s30 = int_to_ptr.vmem [resolvable:$false] %s511_s30 }
  0x22   : > { %s513_s3 = scalar_lea.vmem %s512_s30, 256  ;;  %p514_p12 = scmp.lt.s32.totalorder %s684_s5, %s512_s30 }
  0x23   : > { %p509_p1 = pnand %p507_p13, %p493_p0  ;;  %p515_p3 = scmp.lt.s32.totalorder %s513_s3, %s506_s26 }
  0x25   : > { %p510_p11 = pneg %p509_p1  ;;  %p516_p4 = por %p515_p3, %p514_p12 }
  0x27   : > { %p517_p5 = pnand %p516_p4, %p510_p11 }
  0x29   : > { %520 = shalt.err (!%p517_p5)
}
  0x2a   : > { %407 = dma.hbm_to_vmem [thread:$0]  (!%p690_p10), %s682_s8, 128, %s684_s5, %s126_s17  }
  0x2b   : > { %p791_p2 = scmp.lt.s32.totalorder %s587_s16, 10  ;;  %p792_p6 = scmp.ge.s32.totalorder %s587_s16, 1 }
  0x2d   : > { %p151_p0 = pnand %p792_p6, %p791_p2 }
  0x2e   : > { %s156_s4 = sand.u32 (!%p151_p0), 1, %s563_s10  }
  0x2f   : > { %154 = sbr.rel (%p151_p0) target bundleno = 963 (0x3c3), region = 28  ;;  %s392_s6 = sshll.u32 (!%p151_p0), %s156_s4, 3 }
  0x30   : > { %s157_s7 = scalar_lea.sflag (!%p151_p0), [#allocation6], %s156_s4  ;;  %s160_s20 = scalar_lea.vmem (!%p151_p0), [#allocation5], %s392_s6 }
  0x36   : > { %554 = dma.done.wait (%p666_p7), %s157_s7, 128  }
  0x37   : > { %556 = vsyncadd (%p666_p7), %s157_s7, 4294967168  ;;  %p184_p11 = scmp.lt.s32.totalorder %s575_s13, 2  ;;  %p395_p10 = scmp.ne.s32.totalorder %s571_s12, 0 }
  0x38   : > { %vm196_vm0 = vcmask (!%p395_p10), 7168   ;;  %v590_v0 = vmov (!%p395_p10), -inf   ;;  %v591_v1 = vmov (!%p395_p10), 0.0  }
  0x39   : > { %s807_s13 = smov (!%p184_p11, %s575_s13), 2  ;;  %195 = sbr.rel (%p395_p10) target bundleno = 64 (0x40), region = 36 }
  0x3a   : > { %s393_s5 = sshll.u32 %s807_s13, 3  ;;  %197 = vst.msk [vmem:[#allocation2] sm:$0xff] (!%p395_p10), %vm196_vm0, %v590_v0  ;;  %198 = vst.msk [vmem:[#allocation3] sm:$0xff] (!%p395_p10), %vm196_vm0, %v591_v1 }
  0x3b   : > { %s187_s17 = scalar_lea.vmem %s786_s1, %s393_s5  ;;  %s738_s24 = scalar_lea.vmem %s787_s2, %s393_s5  ;;  %199 = vst.msk [vmem:[#allocation4] sm:$0xff] (!%p395_p10), %vm196_vm0, %v591_v1 }
  0x40 PF: > { %v200_v2 = vld [vmem:[%s160_s20] sm:$0xff]  ;;  %s396_s13 = sshll.u32 %s571_s12, 7  ;;  %v205_v4 = vlaneseq  ;;  %p397_p7 = scmp.ge.s32.totalorder %s571_s12, 2 }
  0x41   : > { %v201_v3 = vld [vmem:[%s187_s17] sm:$0xff]  ;;  %v203_v5 = vstv %s396_s13  ;;  %212 = vmax.xlane.f32.xlu0 (!%p397_p7), %v200_v2  ;;  %v592_v8 = vmov (!%p397_p7), 0   ;;  %vm231_vm1 = vcmask (!%p397_p7), 7168   ;;  %v218_v21 = vld [vmem:[#allocation3] sm:$0xff] (!%p397_p7) }
  0x42   : > { %v204_v6 = vsub.s32 %v201_v3, %v203_v5  ;;  %v744_v7 = vand.u32 127, %v205_v4  ;;  %210 = sbr.rel (%p397_p7) target bundleno = 501 (0x1f5), region = 40  ;;  %477 = vset.pattern.permute.xlu0 (!%p397_p7), %v592_v8  ;;  %478 = vset.pattern.permute.xlu1 (!%p397_p7), %v592_v8  ;;  %v211_v9 = vld [vmem:[#allocation2] sm:$0xff] (!%p397_p7)  ;;  %v234_v25 = vld [vmem:[#allocation4] sm:$0xff] (!%p397_p7) }
  0x44   : > { %236 = vperm.xlu1 (!%p397_p7), %478, %v204_v6  }
  0xc3   : > { %v237_v16 = vpop.permute.xlu1 %236 }
  0xc4   : > { %vm238_vm2 = vcmp.eq.s32.totalorder %v744_v7, %v237_v16 }
  0xc5   : > { %v239_v18 = vsel %vm238_vm2, %v200_v2, 0.0 }
  0xce   : > { %v213_v10 = vpop.xlane.xlu0 %212 }
  0xcf   : > { %v214_v11 = vmax.f32 %v211_v9, %v213_v10 }
  0xd1   : > { %v215_v12 = vsub.f32 %v211_v9, %v214_v11  ;;  %233 = vst.msk [vmem:[#allocation2] sm:$0xff] %vm231_vm1, %v214_v11  ;;  %222 = vperm.xlu0 %477, %v214_v11  }
  0xd3   : > { %v216_v19 = vmul.f32 1.442695, %v215_v12 }
 0x150   : > { %v223_v13 = vpop.permute.xlu0 %222 }
 0x151   : > { %v225_v14 = vsub.f32 %v200_v2, %v223_v13 }
 0x153   : > { %v226_v15 = vmul.f32 1.442695, %v225_v14 }
 0x155   : > { %479 = vpow2.f32 %v226_v15 }
 0x156   : > { %481 = vpow2.f32 %v216_v19 }
 0x15f   : > { %v480_v17 = vpop.eup %479 }
 0x160   : > { %228 = vadd.xlane.f32.xlu1 %v480_v17  ;;  %v482_v20 = vpop.eup %481 }
 0x161   : > { %v219_v22 = vmul.f32 %v482_v20, %v218_v21 }
 0x164   : > { %240 = vadd.xlane.f32.xlu1 %v239_v18 }
 0x1ed   : > { %v229_v23 = vpop.xlane.xlu1 %228 }
 0x1ee   : > { %v230_v24 = vadd.f32 %v229_v23, %v219_v22 }
 0x1f0   : > { %232 = vst.msk [vmem:[#allocation3] sm:$0xff] %vm231_vm1, %v230_v24 }
 0x1f1   : > { %v241_v26 = vpop.xlane.xlu1 %240 }
 0x1f2   : > { %v242_v27 = vadd.f32 %v241_v26, %v234_v25 }
 0x1f4   : > { %243 = vst.msk [vmem:[#allocation4] sm:$0xff] %vm231_vm1, %v242_v27 }
 0x1f5 PF: > { %p398_p12 = scmp.ne.s32.totalorder %s571_s12, 2 }
 0x1f6   : > { %s248_s23 = ssub.s32 (!%p398_p12), 300, %s396_s13  ;;  %v593_v30 = vmov (!%p398_p12), 0   ;;  %v254_v31 = vld [vmem:[#allocation2] sm:$0xff] (!%p398_p12)  ;;  %vm274_vm4 = vcmask (!%p398_p12), 7168  }
 0x1f7   : > { %247 = sbr.rel (%p398_p12) target bundleno = 963 (0x3c3), region = 44  ;;  %v249_v28 = vstv (!%p398_p12), %s248_s23  ;;  %483 = vset.pattern.permute.xlu0 (!%p398_p12), %v593_v30  ;;  %484 = vset.pattern.permute.xlu1 (!%p398_p12), %v593_v30  ;;  %v261_v43 = vld [vmem:[#allocation3] sm:$0xff] (!%p398_p12) }
 0x1f8   : > { %vm250_vm3 = vcmp.lt.s32.totalorder (!%p398_p12), %v744_v7, %v249_v28  ;;  %279 = vperm.xlu1 (!%p398_p12), %484, %v204_v6  }
 0x1f9   : > { %v253_v29 = vsel (!%p398_p12), %vm250_vm3, %v200_v2, -1e+30 }
 0x1fa   : > { %255 = vmax.xlane.f32.xlu0 (!%p398_p12), %v253_v29 }
 0x1fb   : > { %v277_v47 = vld [vmem:[#allocation4] sm:$0xff] (!%p398_p12) }
 0x277   : > { %v280_v38 = vpop.permute.xlu1 %279 }
 0x278   : > { %vm281_vm5 = vcmp.eq.s32.totalorder %v744_v7, %v280_v38 }
 0x279   : > { %v282_v40 = vsel %vm281_vm5, %v253_v29, 0.0 }
 0x287   : > { %v256_v32 = vpop.xlane.xlu0 %255 }
 0x288   : > { %v257_v33 = vmax.f32 %v254_v31, %v256_v32 }
 0x28a   : > { %v258_v34 = vsub.f32 %v254_v31, %v257_v33  ;;  %276 = vst.msk [vmem:[#allocation2] sm:$0xff] %vm274_vm4, %v257_v33  ;;  %265 = vperm.xlu0 %483, %v257_v33  }
 0x28c   : > { %v259_v41 = vmul.f32 1.442695, %v258_v34 }
 0x291   : > { %v287_v53 = vld [vmem:[#allocation2] sm:$0xff] }
 0x309   : > { %v266_v35 = vpop.permute.xlu0 %265 }
 0x30a   : > { %v268_v36 = vsub.f32 %v253_v29, %v266_v35 }
 0x30c   : > { %v269_v37 = vmul.f32 1.442695, %v268_v36 }
 0x30e   : > { %485 = vpow2.f32 %v269_v37 }
 0x30f   : > { %487 = vpow2.f32 %v259_v41 }
 0x318   : > { %v486_v39 = vpop.eup %485 }
 0x319   : > { %271 = vadd.xlane.f32.xlu1 %v486_v39  ;;  %v488_v42 = vpop.eup %487 }
 0x31a   : > { %v262_v44 = vmul.f32 %v488_v42, %v261_v43 }
 0x31d   : > { %283 = vadd.xlane.f32.xlu1 %v282_v40 }
 0x3a6   : > { %v272_v45 = vpop.xlane.xlu1 %271 }
 0x3a7   : > { %v273_v46 = vadd.f32 %v272_v45, %v262_v44 }
 0x3a9   : > { %275 = vst.msk [vmem:[#allocation3] sm:$0xff] %vm274_vm4, %v273_v46 }
 0x3aa   : > { %v284_v48 = vpop.xlane.xlu1 %283 }
 0x3ab   : > { %v285_v49 = vadd.f32 %v284_v48, %v277_v47 }
 0x3ad   : > { %286 = vst.msk [vmem:[#allocation4] sm:$0xff] %vm274_vm4, %v285_v49 }
 0x3b0   : > { %v288_v50 = vld [vmem:[#allocation3] sm:$0xff] }
 0x3b1   : > { %489 = vlog2.f32 %v288_v50 }
 0x3b4   : > { %v292_v54 = vld [vmem:[#allocation4] sm:$0xff] }
 0x3bb   : > { %v490_v51 = vpop.eup %489 }
 0x3bc   : > { %v290_v52 = vmul.f32 0.6931472, %v490_v51 }
 0x3be   : > { %v291_v55 = vadd.f32 %v290_v52, %v287_v53 }
 0x3c0   : > { %v293_v56 = vsub.f32 %v291_v55, %v292_v54 }
 0x3c2   : > { %294 = vst.msk [vmem:[%s738_s24] sm:$0xff] %vm274_vm4, %v293_v56 }
 0x3c3 PF: > { %s15_s16 = sadd.s32 1, %s587_s16   ;;  %s793_s9 = smov %s563_s10 }
 0x3c4   : > { %p12_p8 = scmp.ge.s32.totalorder %s15_s16, 11   ;;  %s794_s10 = smov %s567_s11 }
 0x3c5   : > { %s795_s11 = smov %s676_s29  ;;  %s796_s12 = smov %s579_s14 }
 0x3c6   : > { %s797_s13 = smov %s583_s15  ;;  %s798_s14 = smov %s801_s18 }
 0x3c7   : > { %s799_s15 = smov %s805_s19  ;;  %14 = sbr.rel (!%p12_p8) target bundleno = 5 (0x5), region = 83 }
 0x3ce   :  { %314 = vsyncpa [#allocation6], 1 }
 0x3cf   :  { %316 = vsyncpa [#allocation6 + $0x1], 1 }

</bundles_post_ra>
